<compile_context>
chip_gen: v7x
topology: tpu7x:2x2x1
jax: 0.10.0
libtpu: 0.0.40
codegen_flags: <defaults>
</compile_context>

<pallas_src>
import functools

import jax
import jax.numpy as jnp
from jax import lax
from jax.experimental import pallas as pl
from jax.experimental.pallas import tpu as pltpu


def _round_up(x, m):
    return ((x + m - 1) // m) * m


def _cdiv(a, b):
    return (a + b - 1) // b


# ----------------------------------------------------------------------------
# Kernels
# ----------------------------------------------------------------------------
def _single_k_kernel(x_ref, w_ref, b_ref, o_ref, *, valid_k, mask_k):
    # x_ref: (tm, Kp), w_ref: (Kp, tn) resident, b_ref: (1, tn), o_ref: (tm, tn)
    x = x_ref[...]
    if mask_k:  # static flag: only compiled in when In % 128 != 0
        col = lax.broadcasted_iota(jnp.int32, x.shape, 1)
        x = jnp.where(col < valid_k, x, jnp.zeros_like(x))
    acc = jnp.dot(x, w_ref[...], preferred_element_type=jnp.float32)
    o_ref[...] = (acc + b_ref[...].astype(jnp.float32)).astype(o_ref.dtype)


def _multi_k_kernel(x_ref, w_ref, b_ref, o_ref, acc_ref, *, valid_k, tk, mask_k):
    # Output-stationary accumulation over the K grid axis (last, "arbitrary").
    k = pl.program_id(2)

    @pl.when(k == 0)
    def _():
        acc_ref[...] = jnp.zeros_like(acc_ref)

    x = x_ref[...]
    if mask_k:  # static flag: only the padded K tail needs zeroing
        col = k * tk + lax.broadcasted_iota(jnp.int32, x.shape, 1)
        x = jnp.where(col < valid_k, x, jnp.zeros_like(x))
    acc_ref[...] += jnp.dot(x, w_ref[...], preferred_element_type=jnp.float32)

    @pl.when(k == pl.num_programs(2) - 1)
    def _():
        o_ref[...] = (acc_ref[...] + b_ref[...].astype(jnp.float32)).astype(o_ref.dtype)


# ----------------------------------------------------------------------------
# Tiling / wrapper
# ----------------------------------------------------------------------------
_DEFAULT_TILE_VMEM_BUDGET = 24 << 20  # target double-buffered working set
_PALLAS_MAC_THRESHOLD = 1 << 27       # below ~134M MACs, XLA's fused matmul wins


def _select_tiles(B, Out, Kp, itemsize, budget):
    # N tile: for small Out keep the full dim (no N padding, single lane slab);
    # otherwise 128-multiple tiles with cdiv edge blocks.
    tn = Out if Out <= 512 else 512
    # M tile (multiple of 8).
    tm = min(512, _round_up(B, 8))
    # Guarantee >= 2 blocks over the parallel axes so both v7x TensorCores work.
    if _cdiv(B, tm) * _cdiv(Out, tn) < 2 and B >= 16:
        tm = _round_up(_cdiv(B, 2), 8)

    def working_set(tk):
        ws = 2 * (tm * tk + tk * tn + tm * tn + tn) * itemsize  # dbl-buffered in/out
        if tk < Kp:
            ws += tm * tn * 4  # f32 accumulator scratch
        return ws

    # K tile: prefer tk == Kp (weight resident, single K step, no accumulator);
    # otherwise the largest 128-multiple divisor of Kp that fits the budget.
    nk = Kp // 128
    candidates = sorted({d * 128 for d in range(1, nk + 1) if nk % d == 0},
                        reverse=True)
    tk = candidates[-1]
    for cand in candidates:
        if working_set(cand) <= budget:
            tk = cand
            break
    return tm, tn, tk, working_set(tk)


def _pallas_linear(x, w_t, b2, in_features, *, budget):
    B = x.shape[0]
    Kp, Out = w_t.shape
    itemsize = jnp.dtype(x.dtype).itemsize
    tm, tn, tk, ws = _select_tiles(B, Out, Kp, itemsize, budget)

    grid_m, grid_n, grid_k = _cdiv(B, tm), _cdiv(Out, tn), Kp // tk
    mask_k = in_features != Kp  # only then does x have a garbage K tail to zero

    vmem_limit = int(min(max(ws + (8 << 20), 32 << 20), 48 << 20))
    out_shape = jax.ShapeDtypeStruct((B, Out), x.dtype)

    if grid_k == 1:
        kernel = functools.partial(_single_k_kernel,
                                   valid_k=in_features, mask_k=mask_k)
        grid_spec = pltpu.PrefetchScalarGridSpec(
            num_scalar_prefetch=0,
            grid=(grid_m, grid_n),
            in_specs=[
                pl.BlockSpec((tm, tk), lambda i, j: (i, 0)),  # x
                pl.BlockSpec((tk, tn), lambda i, j: (0, j)),  # W^T (resident)
                pl.BlockSpec((1, tn), lambda i, j: (0, j)),   # bias
            ],
            out_specs=pl.BlockSpec((tm, tn), lambda i, j: (i, j)),
        )
        dims = ("parallel", "parallel")
    else:
        kernel = functools.partial(_multi_k_kernel,
                                   valid_k=in_features, tk=tk, mask_k=mask_k)
        grid_spec = pltpu.PrefetchScalarGridSpec(
            num_scalar_prefetch=0,
            grid=(grid_m, grid_n, grid_k),  # reduction axis last
            in_specs=[
                pl.BlockSpec((tm, tk), lambda i, j, k: (i, k)),  # x
                pl.BlockSpec((tk, tn), lambda i, j, k: (k, j)),  # W^T
                pl.BlockSpec((1, tn), lambda i, j, k: (0, j)),   # bias
            ],
            out_specs=pl.BlockSpec((tm, tn), lambda i, j, k: (i, j)),
            scratch_shapes=[pltpu.VMEM((tm, tn), jnp.float32)],
        )
        dims = ("parallel", "parallel", "arbitrary")

    return pl.pallas_call(
        kernel,
        out_shape=out_shape,
        grid_spec=grid_spec,
        compiler_params=pltpu.CompilerParams(
            dimension_semantics=dims,
            vmem_limit_bytes=vmem_limit,
        ),
    )(x, w_t, b2)


def prepare_linear_params(weight, bias):
    """One-time layout prep (hoisted out of the per-call hot path)."""
    weight = jnp.asarray(weight)
    bias = jnp.asarray(bias)
    out_features, in_features = weight.shape
    assert bias.shape == (out_features,)
    kp = _round_up(in_features, 128)
    w_t = weight.T  # (In, Out): standard (K, N) RHS, no per-tile relayout
    if kp != in_features:
        w_t = jnp.pad(w_t, ((0, kp - in_features), (0, 0)))  # zero K tail, once
    return {
        "w_t": w_t,                           # (Kp, Out)
        "b2": bias.reshape(1, out_features),  # (1, Out)
        "weight": weight,                     # original layout (XLA fallback only)
        "bias": bias,
        "in_features": in_features,
        "out_features": out_features,
    }


def linear_forward(x, params, *, force_pallas=False,
                   vmem_budget_bytes=_DEFAULT_TILE_VMEM_BUDGET):
    in_features = params["in_features"]
    out_features = params["out_features"]
    lead = x.shape[:-1]
    x2 = x.reshape(-1, in_features)
    B = x2.shape[0]

    if not force_pallas and (B * in_features * out_features) < _PALLAS_MAC_THRESHOLD:
        # Tiny layer: pallas_call launch + DMA overhead dominates -> let XLA fuse.
        out = x2 @ params["weight"].T + params["bias"]
    else:
        out = _pallas_linear(x2, params["w_t"], params["b2"], in_features,
                             budget=vmem_budget_bytes)
    return out.reshape(lead + (out_features,))


class LinearRegressionModel:
    """Pallas-TPU port of the PyTorch module: forward(x) = self.linear(x)."""

    def __init__(self, weight, bias):
        self.params = prepare_linear_params(weight, bias)

    def __call__(self, x, *, force_pallas=False,
                 vmem_budget_bytes=_DEFAULT_TILE_VMEM_BUDGET):
        return linear_forward(x, self.params, force_pallas=force_pallas,
                              vmem_budget_bytes=vmem_budget_bytes)


def _reference(x, weight, bias):
    return lax.dot_general(
        x, weight,
        dimension_numbers=(((1,), (1,)), ((), ())),
        precision=lax.Precision.HIGHEST,
    ) + bias


if __name__ == "__main__":
    key = jax.random.PRNGKey(0)
    kx, kw, kb, kx2, kw2, kb2, kx3, kw3, kb3 = jax.random.split(key, 9)

    # --- 1) Tiny shapes consistent with nn.Linear(input_dim, output_dim) ------
    batch, input_dim, output_dim = 8, 32, 8
    bound = 1.0 / (input_dim ** 0.5)
    x = jax.random.normal(kx, (batch, input_dim), dtype=jnp.float32)
    weight = jax.random.uniform(kw, (output_dim, input_dim), jnp.float32, -bound, bound)
    bias = jax.random.uniform(kb, (output_dim,), jnp.float32, -bound, bound)

    model = LinearRegressionModel(weight, bias)
    out_small = model(x)                            # dispatch path -> plain XLA
    out_small_pallas = model(x, force_pallas=True)  # single-K, resident weight, K mask
    jax.block_until_ready((out_small, out_small_pallas))

    ref_small = _reference(x, weight, bias)
    assert out_small.shape == (batch, output_dim)
    assert out_small_pallas.shape == (batch, output_dim)
    assert jnp.allclose(out_small, ref_small, atol=1e-5, rtol=1e-5)
    assert jnp.allclose(out_small_pallas, ref_small, atol=1e-5, rtol=1e-5)

    # --- 2) Moderate, non-tile-aligned: cdiv edge blocks on M (no x padding),
    #        tn = full Out, weight-resident single-K, 2 M blocks for dual-TC. ---
    B2, In2, Out2 = 300, 1152, 200
    bound2 = 1.0 / (In2 ** 0.5)
    x2 = jax.random.normal(kx2, (B2, In2), dtype=jnp.float32)
    w2 = jax.random.uniform(kw2, (Out2, In2), jnp.float32, -bound2, bound2)
    b2v = jax.random.uniform(kb2, (Out2,), jnp.float32, -bound2, bound2)

    model2 = LinearRegressionModel(w2, b2v)
    out_big = model2(x2, force_pallas=True)
    jax.block_until_ready(out_big)
    ref_big = _reference(x2, w2, b2v)
    assert out_big.shape == (B2, Out2)
    assert jnp.allclose(out_big, ref_big, atol=2e-4, rtol=2e-4)

    # --- 3) Force the multi-K accumulator path + in-kernel K-edge masking
    #        (In % 128 != 0) by shrinking the tile VMEM budget. ----------------
    B3, In3, Out3 = 64, 1000, 24
    bound3 = 1.0 / (In3 ** 0.5)
    x3 = jax.random.normal(kx3, (B3, In3), dtype=jnp.float32)
    w3 = jax.random.uniform(kw3, (Out3, In3), jnp.float32, -bound3, bound3)
    b3 = jax.random.uniform(kb3, (Out3,), jnp.float32, -bound3, bound3)

    model3 = LinearRegressionModel(w3, b3)
    out_mk = model3(x3, force_pallas=True, vmem_budget_bytes=300 * 1024)
    jax.block_until_ready(out_mk)
    ref_mk = _reference(x3, w3, b3)
    assert out_mk.shape == (B3, Out3)
    assert jnp.allclose(out_mk, ref_mk, atol=2e-4, rtol=2e-4)

    print("KERNEL_OK")
</pallas_src>

<mosaic_0001>
module attributes {stable_mosaic.version = 11 : i64} {
  func.func @_single_k_kernel(%arg0: i32, %arg1: i32, %arg2: memref<8x128xf32, #tpu.memory_space<vmem>>, %arg3: memref<128x8xf32, #tpu.memory_space<vmem>>, %arg4: memref<1x8xf32, #tpu.memory_space<vmem>>, %arg5: memref<8x8xf32, #tpu.memory_space<vmem>>) attributes {dimension_semantics = [#tpu.dimension_semantics<parallel>, #tpu.dimension_semantics<parallel>], iteration_bounds = array<i64: 1, 1>, scalar_prefetch = 0 : i64, scratch_operands = 0 : i64, tpu.core_type = #tpu.core_type<tc>, window_params = [{transform_indices = @transform_0, window_bounds = array<i64: 8, 128>}, {transform_indices = @transform_1, window_bounds = array<i64: 128, 8>}, {transform_indices = @transform_2, window_bounds = array<i64: 1, 8>}, {transform_indices = @transform_3, window_bounds = array<i64: 8, 8>}]} {
    %c0 = arith.constant 0 : index
    %c0_0 = arith.constant 0 : index
    %0 = vector.load %arg2[%c0, %c0_0] : memref<8x128xf32, #tpu.memory_space<vmem>>, vector<8x128xf32>
    %1 = tpu.iota {dimensions = array<i32: 1>} : vector<8x128xi32>
    %c32_i32 = arith.constant 32 : i32
    %2 = vector.broadcast %c32_i32 : i32 to vector<8x128xi32>
    %3 = arith.cmpi slt, %1, %2 : vector<8x128xi32>
    %cst = arith.constant 0.000000e+00 : f32
    %4 = vector.broadcast %cst : f32 to vector<8x128xf32>
    %5 = arith.select %3, %0, %4 : vector<8x128xi1>, vector<8x128xf32>
    %c0_1 = arith.constant 0 : index
    %c0_2 = arith.constant 0 : index
    %6 = vector.load %arg3[%c0_1, %c0_2] : memref<128x8xf32, #tpu.memory_space<vmem>>, vector<128x8xf32>
    %cst_3 = arith.constant dense<0.000000e+00> : vector<8x8xf32>
    %7 = tpu.matmul %5, %6, %cst_3 {dimension_numbers = #tpu.dot_dimension_numbers<[1], [0], [0], [1], [0, 0, 1, 1], [], []>} : vector<8x128xf32>, vector<128x8xf32>, vector<8x8xf32> -> vector<8x8xf32>
    %c0_4 = arith.constant 0 : index
    %c0_5 = arith.constant 0 : index
    %8 = vector.load %arg4[%c0_4, %c0_5] : memref<1x8xf32, #tpu.memory_space<vmem>>, vector<1x8xf32>
    %9 = vector.broadcast %8 : vector<1x8xf32> to vector<8x8xf32>
    %10 = arith.addf %7, %9 : vector<8x8xf32>
    %c0_6 = arith.constant 0 : index
    %c0_7 = arith.constant 0 : index
    %11 = vector.load %arg5[%c0_6, %c0_7] : memref<8x8xf32, #tpu.memory_space<vmem>>, vector<8x8xf32>
    tpu.vector_store %arg5[%c0_6, %c0_7], %10 {strides = array<i32>} : memref<8x8xf32, #tpu.memory_space<vmem>>, vector<8x8xf32>,
    return
  }
  func.func @transform_0(%arg0: i32, %arg1: i32) -> (i32, i32) {
    %c0_i32 = arith.constant 0 : i32
    %c0_i32_0 = arith.constant 0 : i32
    return %arg0, %c0_i32 : i32, i32
  }
  func.func @transform_1(%arg0: i32, %arg1: i32) -> (i32, i32) {
    %c0_i32 = arith.constant 0 : i32
    %c0_i32_0 = arith.constant 0 : i32
    return %c0_i32, %arg1 : i32, i32
  }
  func.func @transform_2(%arg0: i32, %arg1: i32) -> (i32, i32) {
    %c0_i32 = arith.constant 0 : i32
    %c0_i32_0 = arith.constant 0 : i32
    return %c0_i32, %arg1 : i32, i32
  }
  func.func @transform_3(%arg0: i32, %arg1: i32) -> (i32, i32) {
    %c0_i32 = arith.constant 0 : i32
    return %arg0, %arg1 : i32, i32
  }
}

</mosaic_0001>

<bundles_post_ra>
// kernel: tpu_custom_call.1
= control target key start
LH: loop header
LB: loop body
LE: loop exit
PB: predicated region body
PF: predicated region fallthrough
CT: control target
= control target key end

     0   :  { %v235_v3 = vmov 0.0|0.0   ;;  %vm236_vm0 = vmmov 0   ;;  %v237_v6 = vmov 0.0   ;;  %s325_s0 = inlined_call_operand.vmem [shape: f32[8,32], index: 0, kind: input, shape index: {}]   ;;  %s326_s1 = inlined_call_operand.vmem [shape: f32[128,8], index: 1, kind: input, shape index: {}]   ;;  %s327_s2 = inlined_call_operand.vmem [shape: f32[1,8], index: 2, kind: input, shape index: {}]   ;;  %s328_s3 = inlined_call_operand.hbm [shape: f32[8,8], index: 3, kind: output, shape index: {}]  }
   0x1   :  { %v20_v0 = vld [vmem:[%s326_s1] sm:$0xff]  ;;  %v21_v1 = vld [vmem:[%s326_s1 + $0x8] sm:$0xff]  ;;  %v22_v2 = vld [vmem:[%s326_s1 + $0x10] sm:$0xff]  ;;  %183 = vmatprep.subr.bf16.mxu0 %v235_v3  ;;  %180 = vmatprep.mubr.msk.f32.mxu0 %vm236_vm0, %v237_v6 }
   0x2   :  { %v184_v4 = vpack.c.bf16 %v21_v1, %v20_v0  ;;  %v23_v5 = vld [vmem:[%s326_s1 + $0x18] sm:$0xff]  ;;  %v24_v8 = vld [vmem:[%s326_s1 + $0x20] sm:$0xff]  ;;  %v25_v9 = vld [vmem:[%s326_s1 + $0x28] sm:$0xff] }
   0x3   :  { %v187_v7 = vpack.c.bf16 %v23_v5, %v22_v2 }
   0x4   :  { %185 = vmatpush3.bf16.msra.mxu0 %v184_v4 }
   0x5   :  { %186 = vmatprep.subr.bf16.mxu0 %v235_v3 }
   0x6   :  { %8 = vsyncpa [#allocation3], 0  ;;  %v190_v10 = vpack.c.bf16 %v25_v9, %v24_v8  ;;  %v26_v11 = vld [vmem:[%s326_s1 + $0x30] sm:$0xff]  ;;  %v27_v12 = vld [vmem:[%s326_s1 + $0x38] sm:$0xff]  ;;  %v16_v23 = vlaneseq  ;;  %s238_s21 = smov [#allocation2]   ;;  %vm113_vm2 = vcmask 64512  }
   0x7   :  { %v193_v13 = vpack.c.bf16 %v27_v12, %v26_v11  ;;  %v28_v14 = vld [vmem:[%s326_s1 + $0x40] sm:$0xff]  ;;  %v29_v15 = vld [vmem:[%s326_s1 + $0x48] sm:$0xff]  ;;  %v30_v17 = vld [vmem:[%s326_s1 + $0x50] sm:$0xff]  ;;  %s121_s22 = sshll.u32 %s238_s21, 4  ;;  %s122_s22 = int_to_ptr.vmem [resolvable:$true] %s121_s22 }
   0x8   :  { %188 = vmatpush3.bf16.msra.mxu0 %v187_v7  ;;  %v196_v16 = vpack.c.bf16 %v29_v15, %v28_v14  ;;  %v31_v18 = vld [vmem:[%s326_s1 + $0x58] sm:$0xff]  ;;  %v32_v20 = vld [vmem:[%s326_s1 + $0x60] sm:$0xff]  ;;  %v33_v21 = vld [vmem:[%s326_s1 + $0x68] sm:$0xff]  ;;  %v17_v27 = vand.u32 127, %v16_v23  ;;  %p216_p1 = scmp.lt.s32.totalorder %s122_s22, %s122_s22 }
   0x9   :  { %189 = vmatprep.subr.bf16.mxu0 %v235_v3  ;;  %v199_v19 = vpack.c.bf16 %v31_v18, %v30_v17  ;;  %v202_v22 = vpack.c.bf16 %v33_v21, %v32_v20  ;;  %v34_v24 = vld [vmem:[%s326_s1 + $0x70] sm:$0xff]  ;;  %v35_v25 = vld [vmem:[%s326_s1 + $0x78] sm:$0xff]  ;;  %v15_v28 = vld [vmem:[%s325_s0] sm:$0xff]  ;;  %s211_s1 = scalar_lea.vmem %s122_s22, 128 }
   0xa   :  { %v205_v26 = vpack.c.bf16 %v35_v25, %v34_v24  ;;  %vm18_vm1 = vcmp.lt.s32.totalorder %v17_v27, 32  ;;  %v129_v29 = vld [vmem:[%s327_s2] ss:$0 sm:$0xff]  ;;  %p212_p0 = scmp.ne.s32.totalorder %s122_s22, %s211_s1  ;;  %p217_p2 = scmp.lt.s32.totalorder %s211_s1, %s211_s1 }
   0xc   :  { %191 = vmatpush3.bf16.msra.mxu0 %v190_v10  ;;  %p218_p3 = por %p217_p2, %p216_p1 }
   0xd   :  { %192 = vmatprep.subr.bf16.mxu0 %v235_v3 }
   0xe   :  { %p219_p4 = pnand %p218_p3, %p212_p0 }
  0x10   :  { %194 = vmatpush3.bf16.msra.mxu0 %v193_v13 }
  0x11   :  { %195 = vmatprep.subr.bf16.mxu0 %v235_v3 }
  0x14   :  { %197 = vmatpush3.bf16.msra.mxu0 %v196_v16 }
  0x15   :  { %198 = vmatprep.subr.bf16.mxu0 %v235_v3 }
  0x18   :  { %200 = vmatpush3.bf16.msra.mxu0 %v199_v19 }
  0x19   :  { %201 = vmatprep.subr.bf16.mxu0 %v235_v3 }
  0x1c   :  { %203 = vmatpush3.bf16.msra.mxu0 %v202_v22 }
  0x1d   :  { %204 = vmatprep.subr.bf16.mxu0 %v235_v3 }
  0x20   :  { %206 = vmatpush3.bf16.msra.mxu0 %v205_v26 }
  0x23   :  { %181 = vmatmul.mubr.msk.f32.vlgmr.msra.gmra.mrb[0].mxu0 %vm18_vm1, %v15_v28 }
  0xf6   :  { %v109_v30 = vpop.f32.mrb[0].mxu0 }
  0xf7   :  { %v110_v31 = vadd.f32 %v129_v29, %v109_v30  ;;  %v182_v32 = vpop.f32.mrb[1].mxu0 }
  0xf9   :  { %114 = vst.msk [vmem:[#allocation2] sm:$0xff] %vm113_vm2, %v110_v31 }
  0xfa   :  { %222 = shalt.err (!%p219_p4)
}
  0xfb   :  { %s223_s24 = scalar_lea.hbm %s328_s3, 128 }
  0xfc   :  { %p224_p5 = scmp.ne.s32.totalorder %s328_s3, %s223_s24  ;;  %p227_p6 = scmp.lt.u32.totalorder %s223_s24, %s328_s3 }
  0xfe   :  { %p229_p7 = pnand %p227_p6, %p224_p5 }
 0x100   :  { %232 = shalt.err (!%p229_p7)
}
 0x101   :  { %124 = dma.vmem_to_hbm [thread:$0]  %s122_s22, 128, %s328_s3, [#allocation3]  }
 0x102   :  { %233 = dma.done.wait [#allocation3], 128  }
 0x103   :  { %234 = vsyncadd [#allocation3], 4294967168 }
 0x104   :  { %128 = vsyncpa [#allocation3], 1 }

</bundles_post_ra>
